<compile_context>
chip_gen: v7x
topology: tpu7x:2x2x1
jax: 0.10.0
libtpu: 0.0.40
codegen_flags: <defaults>
</compile_context>

<pallas_src>
import jax
import jax.numpy as jnp
from jax import lax
from jax.experimental import pallas as pl
from jax.experimental.pallas import tpu as pltpu


def gate_predictor_kernel(
    x_ref,      # (B, T, F)  batch-first input (same layout as PyTorch)
    h0_ref,     # (B, H)     initial hidden state
    wih_ref,    # (F, H)     = W_ih^T
    whh_ref,    # (H, H)     = W_hh^T
    brnn_ref,   # (1, H)     = b_ih + b_hh
    wfc_ref,    # (H, G)     = W_fc^T
    bfc_ref,    # (1, G)
    out_ref,    # (B, T, G)  softmax output (batch-first)
):
    B, T, F = x_ref.shape
    H = whh_ref.shape[0]
    G = out_ref.shape[2]

    # --- Hoisted input projection: one big matmul for all timesteps --------
    x_flat = x_ref[...].reshape(B * T, F)                        # (B*T, F)
    xw = (
        jnp.dot(x_flat, wih_ref[...], preferred_element_type=jnp.float32)
        + brnn_ref[...]
    ).reshape(B, T, H)                                           # (B, T, H)

    # --- RNN recurrence: only h @ Whh left on the serial path --------------
    # T is small and static -> fully unrolled Python loop with static slices;
    # h stays in vregs (no VMEM round trip per step).
    whh = whh_ref[...]                                           # (H, H)
    h = h0_ref[...]                                              # (B, H)
    outs = []
    for t in range(T):
        h = jnp.tanh(
            xw[:, t, :]
            + jnp.dot(h, whh, preferred_element_type=jnp.float32)
        )
        outs.append(h)

    # --- Linear head on all timesteps at once -------------------------------
    rnn_all = jnp.stack(outs, axis=1)                            # (B, T, H)
    logits = (
        jnp.dot(
            rnn_all.reshape(B * T, H),
            wfc_ref[...],
            preferred_element_type=jnp.float32,
        )
        + bfc_ref[...]
    ).reshape(B, T, G)                                           # (B, T, G)

    # --- Softmax over the batch axis (PyTorch legacy implicit dim=0) --------
    m = jnp.max(logits, axis=0, keepdims=True)
    e = jnp.exp(logits - m)
    s = jnp.sum(e, axis=0, keepdims=True)
    out_ref[...] = e * pl.reciprocal(s, approx=False)


def gate_predictor_forward(x_btf, h0, params):
    """x_btf: (B, T, F) float32 (batch_first, like PyTorch).  h0: (1, B, H)."""
    B, T, F = x_btf.shape
    H = params["w_hh"].shape[0]
    G = params["w_fc"].shape[0]

    h0_bh = h0[0]                                        # (B, H)
    wih_t = params["w_ih"].T                             # (F, H)
    whh_t = params["w_hh"].T                             # (H, H)
    brnn = (params["b_ih"] + params["b_hh"]).reshape(1, H)
    wfc_t = params["w_fc"].T                             # (H, G)
    bfc = params["b_fc"].reshape(1, G)

    vmem = pl.BlockSpec(memory_space=pltpu.MemorySpace.VMEM)
    return pl.pallas_call(
        gate_predictor_kernel,
        out_shape=jax.ShapeDtypeStruct((B, T, G), jnp.float32),
        in_specs=[vmem] * 7,
        out_specs=vmem,
    )(x_btf, h0_bh, wih_t, whh_t, brnn, wfc_t, bfc)


def _reference_forward(x_btf, h0, params):
    """Pure-JAX reference mirroring the PyTorch module."""
    def cell(h, x_t):
        h_new = jnp.tanh(
            x_t @ params["w_ih"].T + params["b_ih"]
            + h @ params["w_hh"].T + params["b_hh"]
        )
        return h_new, h_new

    x_tbf = jnp.transpose(x_btf, (1, 0, 2))
    _, outs = lax.scan(cell, h0[0], x_tbf)               # (T, B, H)
    out_bth = jnp.transpose(outs, (1, 0, 2))
    logits = out_bth @ params["w_fc"].T + params["b_fc"] # (B, T, G)
    return jax.nn.softmax(logits, axis=0)                # legacy implicit dim=0


def init_params(key, node_feature_dim, hidden_dim, num_gate_types):
    """Deterministic init matching PyTorch shapes (uniform +-1/sqrt(H))."""
    ks = jax.random.split(key, 6)
    s = 1.0 / jnp.sqrt(hidden_dim)
    u = lambda k, shape: jax.random.uniform(k, shape, jnp.float32, -s, s)
    return {
        "w_ih": u(ks[0], (hidden_dim, node_feature_dim)),
        "w_hh": u(ks[1], (hidden_dim, hidden_dim)),
        "b_ih": u(ks[2], (hidden_dim,)),
        "b_hh": u(ks[3], (hidden_dim,)),
        "w_fc": u(ks[4], (num_gate_types, hidden_dim)),
        "b_fc": u(ks[5], (num_gate_types,)),
    }


if __name__ == "__main__":
    B, T = 2, 8                 # batch, sequence length (window of nodes)
    F, H, G = 16, 32, 8         # node_feature_dim, hidden_dim, num_gate_types

    key = jax.random.PRNGKey(0)
    k_x, k_h, k_p = jax.random.split(key, 3)

    x = jax.random.normal(k_x, (B, T, F), jnp.float32)   # graph node features
    h0 = jax.random.normal(k_h, (1, B, H), jnp.float32)  # graph-RNN hidden state
    params = init_params(k_p, F, H, G)

    out = gate_predictor_forward(x, h0, params)
    out = jax.block_until_ready(out)

    ref = _reference_forward(x, h0, params)
    assert out.shape == (B, T, G)
    assert jnp.allclose(out, ref, atol=1e-5, rtol=1e-5), "mismatch vs reference"

    print("KERNEL_OK")
</pallas_src>

<mosaic_0001>
module attributes {stable_mosaic.version = 11 : i64} {
  func.func @gate_predictor_kernel(%arg0: memref<2x8x16xf32, #tpu.memory_space<vmem>>, %arg1: memref<2x32xf32, #tpu.memory_space<vmem>>, %arg2: memref<16x32xf32, #tpu.memory_space<vmem>>, %arg3: memref<32x32xf32, #tpu.memory_space<vmem>>, %arg4: memref<1x32xf32, #tpu.memory_space<vmem>>, %arg5: memref<32x8xf32, #tpu.memory_space<vmem>>, %arg6: memref<1x8xf32, #tpu.memory_space<vmem>>, %arg7: memref<2x8x8xf32, #tpu.memory_space<vmem>>) attributes {dimension_semantics = [], scalar_prefetch = 0 : i64, scratch_operands = 0 : i64, tpu.core_type = #tpu.core_type<tc>} {
    %c0 = arith.constant 0 : index
    %c0_0 = arith.constant 0 : index
    %c0_1 = arith.constant 0 : index
    %0 = vector.load %arg0[%c0, %c0_0, %c0_1] : memref<2x8x16xf32, #tpu.memory_space<vmem>>, vector<2x8x16xf32>
    %1 = vector.shape_cast %0 : vector<2x8x16xf32> to vector<16x16xf32>
    %c0_2 = arith.constant 0 : index
    %c0_3 = arith.constant 0 : index
    %2 = vector.load %arg2[%c0_2, %c0_3] : memref<16x32xf32, #tpu.memory_space<vmem>>, vector<16x32xf32>
    %cst = arith.constant dense<0.000000e+00> : vector<16x32xf32>
    %3 = tpu.matmul %1, %2, %cst {dimension_numbers = #tpu.dot_dimension_numbers<[1], [0], [0], [1], [0, 0, 1, 1], [], []>} : vector<16x16xf32>, vector<16x32xf32>, vector<16x32xf32> -> vector<16x32xf32>
    %c0_4 = arith.constant 0 : index
    %c0_5 = arith.constant 0 : index
    %4 = vector.load %arg4[%c0_4, %c0_5] : memref<1x32xf32, #tpu.memory_space<vmem>>, vector<1x32xf32>
    %5 = vector.broadcast %4 : vector<1x32xf32> to vector<16x32xf32>
    %6 = arith.addf %3, %5 : vector<16x32xf32>
    %7 = vector.shape_cast %6 : vector<16x32xf32> to vector<2x8x32xf32>
    %c0_6 = arith.constant 0 : index
    %c0_7 = arith.constant 0 : index
    %8 = vector.load %arg3[%c0_6, %c0_7] : memref<32x32xf32, #tpu.memory_space<vmem>>, vector<32x32xf32>
    %c0_8 = arith.constant 0 : index
    %c0_9 = arith.constant 0 : index
    %9 = vector.load %arg1[%c0_8, %c0_9] : memref<2x32xf32, #tpu.memory_space<vmem>>, vector<2x32xf32>
    %10 = vector.extract_strided_slice %7 {offsets = [0, 0, 0], sizes = [2, 1, 32], strides = [1, 1, 1]} : vector<2x8x32xf32> to vector<2x1x32xf32>
    %11 = vector.shape_cast %10 : vector<2x1x32xf32> to vector<2x32xf32>
    %cst_10 = arith.constant dense<0.000000e+00> : vector<2x32xf32>
    %12 = tpu.matmul %9, %8, %cst_10 {dimension_numbers = #tpu.dot_dimension_numbers<[1], [0], [0], [1], [0, 0, 1, 1], [], []>} : vector<2x32xf32>, vector<32x32xf32>, vector<2x32xf32> -> vector<2x32xf32>
    %13 = arith.addf %11, %12 : vector<2x32xf32>
    %14 = math.tanh %13 : vector<2x32xf32>
    %15 = vector.extract_strided_slice %7 {offsets = [0, 1, 0], sizes = [2, 1, 32], strides = [1, 1, 1]} : vector<2x8x32xf32> to vector<2x1x32xf32>
    %16 = vector.shape_cast %15 : vector<2x1x32xf32> to vector<2x32xf32>
    %cst_11 = arith.constant dense<0.000000e+00> : vector<2x32xf32>
    %17 = tpu.matmul %14, %8, %cst_11 {dimension_numbers = #tpu.dot_dimension_numbers<[1], [0], [0], [1], [0, 0, 1, 1], [], []>} : vector<2x32xf32>, vector<32x32xf32>, vector<2x32xf32> -> vector<2x32xf32>
    %18 = arith.addf %16, %17 : vector<2x32xf32>
    %19 = math.tanh %18 : vector<2x32xf32>
    %20 = vector.extract_strided_slice %7 {offsets = [0, 2, 0], sizes = [2, 1, 32], strides = [1, 1, 1]} : vector<2x8x32xf32> to vector<2x1x32xf32>
    %21 = vector.shape_cast %20 : vector<2x1x32xf32> to vector<2x32xf32>
    %cst_12 = arith.constant dense<0.000000e+00> : vector<2x32xf32>
    %22 = tpu.matmul %19, %8, %cst_12 {dimension_numbers = #tpu.dot_dimension_numbers<[1], [0], [0], [1], [0, 0, 1, 1], [], []>} : vector<2x32xf32>, vector<32x32xf32>, vector<2x32xf32> -> vector<2x32xf32>
    %23 = arith.addf %21, %22 : vector<2x32xf32>
    %24 = math.tanh %23 : vector<2x32xf32>
    %25 = vector.extract_strided_slice %7 {offsets = [0, 3, 0], sizes = [2, 1, 32], strides = [1, 1, 1]} : vector<2x8x32xf32> to vector<2x1x32xf32>
    %26 = vector.shape_cast %25 : vector<2x1x32xf32> to vector<2x32xf32>
    %cst_13 = arith.constant dense<0.000000e+00> : vector<2x32xf32>
    %27 = tpu.matmul %24, %8, %cst_13 {dimension_numbers = #tpu.dot_dimension_numbers<[1], [0], [0], [1], [0, 0, 1, 1], [], []>} : vector<2x32xf32>, vector<32x32xf32>, vector<2x32xf32> -> vector<2x32xf32>
    %28 = arith.addf %26, %27 : vector<2x32xf32>
    %29 = math.tanh %28 : vector<2x32xf32>
    %30 = vector.extract_strided_slice %7 {offsets = [0, 4, 0], sizes = [2, 1, 32], strides = [1, 1, 1]} : vector<2x8x32xf32> to vector<2x1x32xf32>
    %31 = vector.shape_cast %30 : vector<2x1x32xf32> to vector<2x32xf32>
    %cst_14 = arith.constant dense<0.000000e+00> : vector<2x32xf32>
    %32 = tpu.matmul %29, %8, %cst_14 {dimension_numbers = #tpu.dot_dimension_numbers<[1], [0], [0], [1], [0, 0, 1, 1], [], []>} : vector<2x32xf32>, vector<32x32xf32>, vector<2x32xf32> -> vector<2x32xf32>
    %33 = arith.addf %31, %32 : vector<2x32xf32>
    %34 = math.tanh %33 : vector<2x32xf32>
    %35 = vector.extract_strided_slice %7 {offsets = [0, 5, 0], sizes = [2, 1, 32], strides = [1, 1, 1]} : vector<2x8x32xf32> to vector<2x1x32xf32>
    %36 = vector.shape_cast %35 : vector<2x1x32xf32> to vector<2x32xf32>
    %cst_15 = arith.constant dense<0.000000e+00> : vector<2x32xf32>
    %37 = tpu.matmul %34, %8, %cst_15 {dimension_numbers = #tpu.dot_dimension_numbers<[1], [0], [0], [1], [0, 0, 1, 1], [], []>} : vector<2x32xf32>, vector<32x32xf32>, vector<2x32xf32> -> vector<2x32xf32>
    %38 = arith.addf %36, %37 : vector<2x32xf32>
    %39 = math.tanh %38 : vector<2x32xf32>
    %40 = vector.extract_strided_slice %7 {offsets = [0, 6, 0], sizes = [2, 1, 32], strides = [1, 1, 1]} : vector<2x8x32xf32> to vector<2x1x32xf32>
    %41 = vector.shape_cast %40 : vector<2x1x32xf32> to vector<2x32xf32>
    %cst_16 = arith.constant dense<0.000000e+00> : vector<2x32xf32>
    %42 = tpu.matmul %39, %8, %cst_16 {dimension_numbers = #tpu.dot_dimension_numbers<[1], [0], [0], [1], [0, 0, 1, 1], [], []>} : vector<2x32xf32>, vector<32x32xf32>, vector<2x32xf32> -> vector<2x32xf32>
    %43 = arith.addf %41, %42 : vector<2x32xf32>
    %44 = math.tanh %43 : vector<2x32xf32>
    %45 = vector.extract_strided_slice %7 {offsets = [0, 7, 0], sizes = [2, 1, 32], strides = [1, 1, 1]} : vector<2x8x32xf32> to vector<2x1x32xf32>
    %46 = vector.shape_cast %45 : vector<2x1x32xf32> to vector<2x32xf32>
    %cst_17 = arith.constant dense<0.000000e+00> : vector<2x32xf32>
    %47 = tpu.matmul %44, %8, %cst_17 {dimension_numbers = #tpu.dot_dimension_numbers<[1], [0], [0], [1], [0, 0, 1, 1], [], []>} : vector<2x32xf32>, vector<32x32xf32>, vector<2x32xf32> -> vector<2x32xf32>
    %48 = arith.addf %46, %47 : vector<2x32xf32>
    %49 = math.tanh %48 : vector<2x32xf32>
    %50 = vector.shape_cast %14 : vector<2x32xf32> to vector<2x1x32xf32>
    %51 = vector.shape_cast %19 : vector<2x32xf32> to vector<2x1x32xf32>
    %52 = vector.shape_cast %24 : vector<2x32xf32> to vector<2x1x32xf32>
    %53 = vector.shape_cast %29 : vector<2x32xf32> to vector<2x1x32xf32>
    %54 = vector.shape_cast %34 : vector<2x32xf32> to vector<2x1x32xf32>
    %55 = vector.shape_cast %39 : vector<2x32xf32> to vector<2x1x32xf32>
    %56 = vector.shape_cast %44 : vector<2x32xf32> to vector<2x1x32xf32>
    %57 = vector.shape_cast %49 : vector<2x32xf32> to vector<2x1x32xf32>
    %58 = tpu.concatenate %50, %51, %52, %53, %54, %55, %56, %57 in 1 : vector<2x1x32xf32>, vector<2x1x32xf32>, vector<2x1x32xf32>, vector<2x1x32xf32>, vector<2x1x32xf32>, vector<2x1x32xf32>, vector<2x1x32xf32>, vector<2x1x32xf32> -> vector<2x8x32xf32>
    %59 = vector.shape_cast %58 : vector<2x8x32xf32> to vector<16x32xf32>
    %c0_18 = arith.constant 0 : index
    %c0_19 = arith.constant 0 : index
    %60 = vector.load %arg5[%c0_18, %c0_19] : memref<32x8xf32, #tpu.memory_space<vmem>>, vector<32x8xf32>
    %cst_20 = arith.constant dense<0.000000e+00> : vector<16x8xf32>
    %61 = tpu.matmul %59, %60, %cst_20 {dimension_numbers = #tpu.dot_dimension_numbers<[1], [0], [0], [1], [0, 0, 1, 1], [], []>} : vector<16x32xf32>, vector<32x8xf32>, vector<16x8xf32> -> vector<16x8xf32>
    %c0_21 = arith.constant 0 : index
    %c0_22 = arith.constant 0 : index
    %62 = vector.load %arg6[%c0_21, %c0_22] : memref<1x8xf32, #tpu.memory_space<vmem>>, vector<1x8xf32>
    %63 = vector.broadcast %62 : vector<1x8xf32> to vector<16x8xf32>
    %64 = arith.addf %61, %63 : vector<16x8xf32>
    %65 = vector.shape_cast %64 : vector<16x8xf32> to vector<2x8x8xf32>
    %cst_23 = arith.constant dense<0xFF800000> : vector<8x8xf32>
    %66 = vector.multi_reduction <maximumf>, %65, %cst_23 [0] : vector<2x8x8xf32> to vector<8x8xf32>
    %67 = vector.shape_cast %66 : vector<8x8xf32> to vector<1x8x8xf32>
    %68 = vector.broadcast %67 : vector<1x8x8xf32> to vector<2x8x8xf32>
    %69 = arith.subf %65, %68 : vector<2x8x8xf32>
    %70 = math.exp %69 : vector<2x8x8xf32>
    %cst_24 = arith.constant dense<0.000000e+00> : vector<8x8xf32>
    %71 = vector.multi_reduction <add>, %70, %cst_24 [0] : vector<2x8x8xf32> to vector<8x8xf32>
    %72 = vector.shape_cast %71 : vector<8x8xf32> to vector<1x8x8xf32>
    %73 = tpu.reciprocal %72 : vector<1x8x8xf32> -> vector<1x8x8xf32>
    %74 = vector.broadcast %73 : vector<1x8x8xf32> to vector<2x8x8xf32>
    %75 = arith.mulf %70, %74 : vector<2x8x8xf32>
    %c0_25 = arith.constant 0 : index
    %c0_26 = arith.constant 0 : index
    %c0_27 = arith.constant 0 : index
    %76 = vector.load %arg7[%c0_25, %c0_26, %c0_27] : memref<2x8x8xf32, #tpu.memory_space<vmem>>, vector<2x8x8xf32>
    tpu.vector_store %arg7[%c0_25, %c0_26, %c0_27], %75 {strides = array<i32>} : memref<2x8x8xf32, #tpu.memory_space<vmem>>, vector<2x8x8xf32>,
    return
  }
}

</mosaic_0001>

<bundles_post_ra>
// kernel: tpu_custom_call.1
= control target key start
LH: loop header
LB: loop body
LE: loop exit
PB: predicated region body
PF: predicated region fallthrough
CT: control target
= control target key end

     0   :  { %12 = vsyncpa [#allocation3], 0  ;;  %s1553_s0 = inlined_call_operand.vmem [shape: f32[2,8,16], index: 0, kind: input, shape index: {}]   ;;  %s1554_s1 = inlined_call_operand.vmem [shape: f32[2,32], index: 1, kind: input, shape index: {}]   ;;  %s1555_s2 = inlined_call_operand.hbm [shape: f32[16,32], index: 2, kind: input, shape index: {}]   ;;  %s1556_s3 = inlined_call_operand.vmem [shape: f32[32,32], index: 3, kind: input, shape index: {}]   ;;  %s1557_s4 = inlined_call_operand.hbm [shape: f32[1,32], index: 4, kind: input, shape index: {}]   ;;  %s1558_s5 = inlined_call_operand.vmem [shape: f32[32,8], index: 5, kind: input, shape index: {}]   ;;  %s1559_s6 = inlined_call_operand.vmem [shape: f32[1,8], index: 6, kind: input, shape index: {}]   ;;  %s1560_s7 = inlined_call_operand.hbm [shape: f32[2,8,8], index: 7, kind: output, shape index: {}]  }
   0x1   :  { %13 = vsyncpa [#allocation6], 0 }
   0x2   :  { %14 = vsyncpa [#allocation4], 0  ;;  %s1330_s24 = smov [#allocation2]   ;;  %s1258_s28 = scalar_lea.hbm %s1555_s2, 256 }
   0x3   :  { %s24_s25 = sshll.u32 %s1330_s24, 4  ;;  %p1259_p0 = scmp.ne.s32.totalorder %s1555_s2, %s1258_s28  ;;  %s25_s25 = int_to_ptr.vmem [resolvable:$true] %s24_s25 }
   0x4   :  { %p1262_p1 = scmp.lt.u32.totalorder %s1258_s28, %s1555_s2 }
   0x6   :  { %p1264_p2 = pnand %p1262_p1, %p1259_p0 }
   0x8   :  { %1267 = shalt.err (!%p1264_p2)
}
   0x9   :  { %s1268_s10 = scalar_lea.vmem %s25_s25, 256  ;;  %p1273_p4 = scmp.lt.s32.totalorder %s25_s25, %s25_s25 }
   0xa   :  { %p1269_p3 = scmp.ne.s32.totalorder %s25_s25, %s1268_s10  ;;  %p1274_p5 = scmp.lt.s32.totalorder %s1268_s10, %s1268_s10 }
   0xc   :  { %p1275_p6 = por %p1274_p5, %p1273_p4 }
   0xe   :  { %p1276_p7 = pnand %p1275_p6, %p1269_p3 }
  0x10   :  { %1279 = shalt.err (!%p1276_p7)
}
  0x11   :  { %s1331_s11 = smov 128   ;;  %s1332_s12 = smov 8  }
  0x12   :  { %30 = dma.hbm_to_vmem [thread:$0]  %s1555_s2, 256, %s25_s25, [#allocation3], %s1331_s11, %s1331_s11, %s1332_s12  }
  0x13   :  { %s1333_s15 = smov [#allocation5]   ;;  %s1280_s19 = scalar_lea.hbm %s1557_s4, 16 }
  0x14   :  { %s39_s16 = sshll.u32 %s1333_s15, 4  ;;  %p1281_p8 = scmp.ne.s32.totalorder %s1557_s4, %s1280_s19  ;;  %s40_s16 = int_to_ptr.vmem [resolvable:$true] %s39_s16 }
  0x15   :  { %p1284_p9 = scmp.lt.u32.totalorder %s1280_s19, %s1557_s4 }
  0x17   :  { %p1286_p10 = pnand %p1284_p9, %p1281_p8 }
  0x19   :  { %1289 = shalt.err (!%p1286_p10)
}
  0x1a   :  { %s1290_s24 = scalar_lea.vmem %s40_s16, 16  ;;  %s1294_s2 = scalar_lea.vmem %s40_s16, 32 }
  0x1b   :  { %p1291_p11 = scmp.ne.s32.totalorder %s40_s16, %s1290_s24  ;;  %p1295_p12 = scmp.lt.s32.totalorder %s40_s16, %s40_s16 }
  0x1c   :  { %p1296_p13 = scmp.lt.s32.totalorder %s1294_s2, %s1290_s24 }
  0x1e   :  { %p1297_p0 = por %p1296_p13, %p1295_p12 }
  0x20   :  { %p1298_p1 = pnand %p1297_p0, %p1291_p11 }
  0x22   :  { %1301 = shalt.err (!%p1298_p1)
}
  0x23   :  { %42 = dma.hbm_to_vmem [thread:$0]  %s1557_s4, 16, %s40_s16, [#allocation6]  }
  0x24   :  { %1324 = dma.done.wait [#allocation3], 256  }
  0x25   :  { %1325 = vsyncadd [#allocation3], 4294967040 }
  0x26   :  { %1326 = dma.done.wait [#allocation6], 16  }
  0x27   :  { %1327 = vsyncadd [#allocation6], 4294967280  ;;  %v1334_v0 = vmov 0.0|0.0   ;;  %vm1335_vm0 = vmmov 0   ;;  %v1336_v1 = vmov 0.0   ;;  %vm64_vm1 = vcmask 130048  }
  0x28   :  { %1156 = vmatprep.subr.bf16.mxu1 %v1334_v0  ;;  %1061 = vmatprep.mubr.msk.f32.mxu1 %vm1335_vm0, %v1336_v1  ;;  %v55_v2 = vld [vmem:[#allocation2] sm:$0xff]  ;;  %v56_v3 = vld [vmem:[#allocation2 + $0x8] sm:$0xff]  ;;  %v148_v9 = vld [vmem:[%s1556_s3 + $0x10] sm:$0xff]  ;;  %vm151_vm2 = vcmask 261120   ;;  %vm236_vm3 = vcmask 1041409   ;;  %vm833_vm4 = vcmask 1040384  }
  0x29   :  { %v146_v4 = vld [vmem:[%s1556_s3] sm:$0xff]  ;;  %v1152_v5 = vpack.c.bf16 %v56_v3, %v55_v2  ;;  %v147_v6 = vld [vmem:[%s1556_s3 + $0x8] sm:$0xff]  ;;  %v149_v10 = vld [vmem:[%s1556_s3 + $0x18] sm:$0xff]  ;;  %vm836_vm5 = vcmask 1041408   ;;  %vm839_vm6 = vcmask 1042432   ;;  %vm842_vm7 = vcmask 1043456  }
  0x2a   :  { %v53_v7 = vld [vmem:[%s1553_s0] sm:$0xff]  ;;  %v1417_v8 = vpack.c.bf16 %v147_v6, %v146_v4  ;;  %v54_v11 = vld [vmem:[%s1553_s0 + $0x8] sm:$0xff]  ;;  %v1430_v12 = vpack.c.bf16 %v149_v10, %v148_v9  ;;  %v982_v15 = vld [vmem:[#allocation5] ss:$0 sm:$0xff]  ;;  %vm845_vm8 = vcmask 1044480   ;;  %vm848_vm9 = vcmask 1045504  }
  0x2b   :  { %1050 = vmatprep.mubr.msk.f32.mxu0 %vm64_vm1, %v53_v7  ;;  %1153 = vmatprep.subr.bf16.mxu0 %v1152_v5  ;;  %v150_v13 = vld [vmem:[%s1554_s1] sm:$0x3]  ;;  %vm851_vm10 = vcmask 1046528   ;;  %vm946_vm11 = vcmask 64512  }
  0x2c   :  { %1158 = vmatpush3.bf16.msra.mxu1 %v1417_v8  ;;  %1155 = vmatpush3.bf16.msra.mxu0 %v1152_v5 }
  0x2d   :  { %1159 = vmatprep.subr.bf16.mxu1 %v1334_v0  ;;  %1162 = vmatprep.subr.bf16.mxu0 %v1334_v0 }
  0x2f   :  { %1051 = vmatmul.mubr.msk.f32.vlgmr.msra.gmra.mrb[0].mxu0 %vm64_vm1, %v54_v11 }
  0x30   :  { %1161 = vmatpush3.bf16.msra.mxu1 %v1430_v12  ;;  %1164 = vmatpush3.bf16.msra.mxu0 %v1417_v8 }
  0x31   :  { %1165 = vmatprep.subr.bf16.mxu0 %v1334_v0  ;;  %1072 = vmatprep.mubr.msk.f32.mxu0 %vm1335_vm0, %v1336_v1 }
  0x32   :  { %1168 = vmatprep.subr.bf16.mxu1 %v1334_v0 }
  0x33   :  { %1062 = vmatmul.mubr.msk.f32.vlgmr.msra.gmra.mrb[0].mxu1 %vm151_vm2, %v150_v13 }
  0x34   :  { %1167 = vmatpush3.bf16.msra.mxu0 %v1430_v12  ;;  %1170 = vmatpush3.bf16.msra.mxu1 %v1417_v8 }
  0x35   :  { %1171 = vmatprep.subr.bf16.mxu1 %v1334_v0  ;;  %1083 = vmatprep.mubr.msk.f32.mxu1 %vm1335_vm0, %v1336_v1 }
  0x36   :  { %1174 = vmatprep.subr.bf16.mxu0 %v1334_v0 }
  0x38   :  { %1173 = vmatpush3.bf16.msra.mxu1 %v1430_v12 }
  0x39   :  { %1180 = vmatprep.subr.bf16.mxu1 %v1334_v0 }
 0x102   :  { %v1052_v14 = vpop.f32.mrb[0].mxu0 }
 0x103   :  { %v137_v16 = vpop.f32.mrb[1].mxu0  ;;  %v1453_v17 = vadd.f32 %v1052_v14, %v982_v15 }
 0x104   :  { %v1455_v18 = vadd.f32 %v982_v15, %v137_v16 }
 0x106   :  { %v221_v19 = vpop.f32.mrb[0].mxu1 }
 0x107   :  { %v226_v20 = vrot.slane %v221_v19, 1  ;;  %v1063_v21 = vpop.f32.mrb[1].mxu1  ;;  %v229_v22 = vadd.f32 %v221_v19, %v1455_v18 }
 0x109   :  { %v230_v23 = vadd.f32 %v226_v20, %v1453_v17 }
 0x10b   :  { %1220 = vtanh.f32 %v230_v23 }
 0x10c   :  { %1222 = vtanh.f32 %v229_v22 }
 0x115   :  { %v1221_v24 = vpop.eup %1220 }
 0x116   :  { %v235_v25 = vrot.slane %v1221_v24, 7  ;;  %v1223_v26 = vpop.eup %1222 }
 0x118   :  { %v237_v27 = vsel %vm236_vm3, %v235_v25, %v1223_v26 }
 0x119   :  { %1073 = vmatmul.mubr.msk.f32.vlgmr.msra.gmra.mrb[2].mxu0 %vm151_vm2, %v237_v27 }
 0x11a   :  { %1176 = vmatpush3.bf16.msra.mxu0 %v1417_v8  ;;  %1094 = vmatprep.mubr.msk.f32.mxu0 %vm1335_vm0, %v1336_v1 }
 0x11b   :  { %1177 = vmatprep.subr.bf16.mxu0 %v1334_v0 }
 0x11e   :  { %1179 = vmatpush3.bf16.msra.mxu0 %v1430_v12 }
 0x11f   :  { %1186 = vmatprep.subr.bf16.mxu0 %v1334_v0 }
 0x1ec   :  { %v306_v28 = vpop.f32.mrb[2].mxu0 }
 0x1ed   :  { %v311_v29 = vrot.slane %v306_v28, 7  ;;  %v1074_v30 = vpop.f32.mrb[3].mxu0  ;;  %v315_v32 = vadd.f32 %v306_v28, %v1453_v17 }
 0x1ef   :  { %v314_v31 = vadd.f32 %v311_v29, %v1455_v18 }
 0x1f1   :  { %1224 = vtanh.f32 %v314_v31 }
 0x1f2   :  { %1226 = vtanh.f32 %v315_v32 }
 0x1fb   :  { %v1225_v33 = vpop.eup %1224 }
 0x1fc   :  { %v320_v34 = vrot.slane %v1225_v33, 1  ;;  %v1227_v35 = vpop.eup %1226  ;;  %v834_v44 = vsel %vm833_vm4, %v1223_v26, %v1225_v33 }
 0x1fd   :  { %v835_v48 = vsel %vm833_vm4, %v1221_v24, %v1227_v35 }
 0x1fe   :  { %v321_v36 = vsel %vm236_vm3, %v1227_v35, %v320_v34 }
 0x1ff   :  { %1084 = vmatmul.mubr.msk.f32.vlgmr.msra.gmra.mrb[2].mxu1 %vm151_vm2, %v321_v36 }
 0x200   :  { %1182 = vmatpush3.bf16.msra.mxu1 %v1417_v8  ;;  %1105 = vmatprep.mubr.msk.f32.mxu1 %vm1335_vm0, %v1336_v1 }
 0x201   :  { %1183 = vmatprep.subr.bf16.mxu1 %v1334_v0 }
 0x204   :  { %1185 = vmatpush3.bf16.msra.mxu1 %v1430_v12 }
 0x205   :  { %1192 = vmatprep.subr.bf16.mxu1 %v1334_v0 }
 0x2d2   :  { %v390_v37 = vpop.f32.mrb[2].mxu1 }
 0x2d3   :  { %v395_v38 = vrot.slane %v390_v37, 6  ;;  %v396_v39 = vrot.slane %v390_v37, 7  ;;  %v1085_v40 = vpop.f32.mrb[3].mxu1 }
 0x2d5   :  { %v399_v41 = vadd.f32 %v395_v38, %v1455_v18  ;;  %v400_v42 = vadd.f32 %v396_v39, %v1453_v17 }
 0x2d7   :  { %1228 = vtanh.f32 %v399_v41 }
 0x2d8   :  { %1230 = vtanh.f32 %v400_v42  ;;  %v854_v42 = vld [vmem:[%s1558_s5] sm:$0xff] }
 0x2e1   :  { %v1229_v43 = vpop.eup %1228 }
 0x2e2   :  { %v1231_v45 = vpop.eup %1230  ;;  %v405_v46 = vrot.slane %v1229_v43, 2  ;;  %v837_v47 = vsel %vm836_vm5, %v834_v44, %v1229_v43  ;;  %v855_v43 = vld [vmem:[%s1558_s5 + $0x8] sm:$0xff]  ;;  %v856_v44 = vld [vmem:[%s1558_s5 + $0x10] sm:$0xff] }
 0x2e3   :  { %v406_v49 = vrot.slane %v1231_v45, 1  ;;  %v838_v50 = vsel %vm836_vm5, %v835_v48, %v1231_v45  ;;  %v1204_v45 = vpack.c.bf16 %v855_v43, %v854_v42 }
 0x2e5   :  { %v407_v51 = vsel %vm236_vm3, %v406_v49, %v405_v46  ;;  %v857_v46 = vld [vmem:[%s1558_s5 + $0x18] sm:$0xff] }
 0x2e6   :  { %1095 = vmatmul.mubr.msk.f32.vlgmr.msra.gmra.mrb[4].mxu0 %vm151_vm2, %v407_v51 }
 0x2e7   :  { %1188 = vmatpush3.bf16.msra.mxu0 %v1417_v8  ;;  %1116 = vmatprep.mubr.msk.f32.mxu0 %vm1335_vm0, %v1336_v1 }
 0x2e8   :  { %1189 = vmatprep.subr.bf16.mxu0 %v1334_v0 }
 0x2eb   :  { %1191 = vmatpush3.bf16.msra.mxu0 %v1430_v12 }
 0x2ec   :  { %1198 = vmatprep.subr.bf16.mxu0 %v1334_v0 }
 0x3b9   :  { %v476_v52 = vpop.f32.mrb[4].mxu0 }
 0x3ba   :  { %v481_v53 = vrot.slane %v476_v52, 5  ;;  %v482_v54 = vrot.slane %v476_v52, 6  ;;  %v1096_v55 = vpop.f32.mrb[5].mxu0 }
 0x3bc   :  { %v485_v56 = vadd.f32 %v481_v53, %v1455_v18  ;;  %v486_v57 = vadd.f32 %v482_v54, %v1453_v17 }
 0x3be   :  { %1232 = vtanh.f32 %v485_v56 }
 0x3bf   :  { %1234 = vtanh.f32 %v486_v57 }
 0x3c8   :  { %v1233_v58 = vpop.eup %1232 }
 0x3c9   :  { %v1235_v59 = vpop.eup %1234  ;;  %v491_v60 = vrot.slane %v1233_v58, 3  ;;  %v840_v61 = vsel %vm839_vm6, %v837_v47, %v1233_v58  ;;  %v1208_v47 = vpack.c.bf16 %v857_v46, %v856_v44  ;;  %v993_v58 = vld [vmem:[%s1559_s6] ss:$0 sm:$0xff]  ;;  %s1337_s6 = smov [#allocation7]  }
 0x3ca   :  { %v492_v62 = vrot.slane %v1235_v59, 2  ;;  %v841_v63 = vsel %vm839_vm6, %v838_v50, %v1235_v59  ;;  %s969_s2 = sshll.u32 %s1337_s6, 4  ;;  %s970_s2 = int_to_ptr.vmem [resolvable:$true] %s969_s2 }
 0x3cb   :  { %s1302_s25 = scalar_lea.vmem %s970_s2, 256  ;;  %p1307_p3 = scmp.lt.s32.totalorder %s970_s2, %s970_s2 }
 0x3cc   :  { %v493_v2 = vsel %vm236_vm3, %v492_v62, %v491_v60  ;;  %p1303_p2 = scmp.ne.s32.totalorder %s970_s2, %s1302_s25  ;;  %p1308_p4 = scmp.lt.s32.totalorder %s1302_s25, %s1302_s25 }
 0x3cd   :  { %1106 = vmatmul.mubr.msk.f32.vlgmr.msra.gmra.mrb[4].mxu1 %vm151_vm2, %v493_v2 }
 0x3ce   :  { %1194 = vmatpush3.bf16.msra.mxu1 %v1417_v8  ;;  %1127 = vmatprep.mubr.msk.f32.mxu1 %vm1335_vm0, %v1336_v1  ;;  %p1309_p5 = por %p1308_p4, %p1307_p3 }
 0x3cf   :  { %1195 = vmatprep.subr.bf16.mxu1 %v1334_v0 }
 0x3d0   :  { %p1310_p6 = pnand %p1309_p5, %p1303_p2 }
 0x3d2   :  { %1197 = vmatpush3.bf16.msra.mxu1 %v1430_v12 }
 0x3d3   :  { %1205 = vmatprep.subr.bf16.mxu1 %v1204_v45 }
 0x4a0   :  { %v562_v3 = vpop.f32.mrb[4].mxu1 }
 0x4a1   :  { %v567_v4 = vrot.slane %v562_v3, 4  ;;  %v568_v5 = vrot.slane %v562_v3, 5  ;;  %v1107_v6 = vpop.f32.mrb[5].mxu1 }
 0x4a3   :  { %v571_v7 = vadd.f32 %v567_v4, %v1455_v18  ;;  %v572_v9 = vadd.f32 %v568_v5, %v1453_v17 }
 0x4a5   :  { %1236 = vtanh.f32 %v571_v7 }
 0x4a6   :  { %1238 = vtanh.f32 %v572_v9 }
 0x4af   :  { %v1237_v10 = vpop.eup %1236 }
 0x4b0   :  { %v1239_v11 = vpop.eup %1238  ;;  %v577_v13 = vrot.slane %v1237_v10, 4  ;;  %v843_v14 = vsel %vm842_vm7, %v840_v61, %v1237_v10 }
 0x4b1   :  { %v578_v15 = vrot.slane %v1239_v11, 3  ;;  %v844_v16 = vsel %vm842_vm7, %v841_v63, %v1239_v11 }
 0x4b3   :  { %v579_v19 = vsel %vm236_vm3, %v578_v15, %v577_v13 }
 0x4b4   :  { %1117 = vmatmul.mubr.msk.f32.vlgmr.msra.gmra.mrb[6].mxu0 %vm151_vm2, %v579_v19 }
 0x4b5   :  { %1200 = vmatpush3.bf16.msra.mxu0 %v1417_v8  ;;  %1138 = vmatprep.mubr.msk.f32.mxu0 %vm1335_vm0, %v1336_v1 }
 0x4b6   :  { %1201 = vmatprep.subr.bf16.mxu0 %v1334_v0 }
 0x4b9   :  { %1203 = vmatpush3.bf16.msra.mxu0 %v1430_v12 }
 0x587   :  { %v648_v20 = vpop.f32.mrb[6].mxu0 }
 0x588   :  { %v653_v21 = vrot.slane %v648_v20, 3  ;;  %v654_v22 = vrot.slane %v648_v20, 4  ;;  %v1118_v23 = vpop.f32.mrb[7].mxu0 }
 0x58a   :  { %v657_v24 = vadd.f32 %v653_v21, %v1455_v18  ;;  %v658_v25 = vadd.f32 %v654_v22, %v1453_v17 }
 0x58c   :  { %1240 = vtanh.f32 %v657_v24 }
 0x58d   :  { %1242 = vtanh.f32 %v658_v25 }
 0x596   :  { %v1241_v26 = vpop.eup %1240 }
 0x597   :  { %v1243_v8 = vpop.eup %1242  ;;  %v663_v27 = vrot.slane %v1241_v26, 5  ;;  %v846_v28 = vsel %vm845_vm8, %v843_v14, %v1241_v26 }
 0x598   :  { %v664_v1 = vrot.slane %v1243_v8, 4  ;;  %v847_v29 = vsel %vm845_vm8, %v844_v16, %v1243_v8 }
 0x59a   :  { %v665_v0 = vsel %vm236_vm3, %v664_v1, %v663_v27 }
 0x59b   :  { %1128 = vmatmul.mubr.msk.f32.vlgmr.msra.gmra.mrb[6].mxu1 %vm151_vm2, %v665_v0 }
 0x59c   :  { %1207 = vmatpush3.bf16.msra.mxu1 %v1204_v45 }
 0x59d   :  { %1209 = vmatprep.subr.bf16.mxu1 %v1208_v47 }
 0x5a0   :  { %1211 = vmatpush3.bf16.msra.mxu1 %v1208_v47 }
 0x66e   :  { %v734_v12 = vpop.f32.mrb[6].mxu1 }
 0x66f   :  { %v739_v30 = vrot.slane %v734_v12, 2  ;;  %v740_v31 = vrot.slane %v734_v12, 3  ;;  %v1129_v32 = vpop.f32.mrb[7].mxu1 }
 0x671   :  { %v743_v33 = vadd.f32 %v739_v30, %v1455_v18  ;;  %v744_v34 = vadd.f32 %v740_v31, %v1453_v17 }
 0x673   :  { %1244 = vtanh.f32 %v743_v33 }
 0x674   :  { %1246 = vtanh.f32 %v744_v34 }
 0x67d   :  { %v1245_v35 = vpop.eup %1244 }
 0x67e   :  { %v1247_v36 = vpop.eup %1246  ;;  %v749_v37 = vrot.slane %v1245_v35, 6  ;;  %v849_v38 = vsel %vm848_vm9, %v846_v28, %v1245_v35 }
 0x67f   :  { %v750_v39 = vrot.slane %v1247_v36, 5  ;;  %v850_v40 = vsel %vm848_vm9, %v847_v29, %v1247_v36 }
 0x681   :  { %v751_v41 = vsel %vm236_vm3, %v750_v39, %v749_v37 }
 0x682   :  { %1139 = vmatmul.mubr.msk.f32.vlgmr.msra.gmra.mrb[8].mxu0 %vm151_vm2, %v751_v41 }
 0x755   :  { %v820_v48 = vpop.f32.mrb[8].mxu0 }
 0x756   :  { %v825_v49 = vrot.slane %v820_v48, 1  ;;  %v826_v50 = vrot.slane %v820_v48, 2  ;;  %v1140_v51 = vpop.f32.mrb[9].mxu0 }
 0x758   :  { %v829_v52 = vadd.f32 %v825_v49, %v1455_v18  ;;  %v830_v53 = vadd.f32 %v826_v50, %v1453_v17 }
 0x75a   :  { %1248 = vtanh.f32 %v829_v52 }
 0x75b   :  { %1250 = vtanh.f32 %v830_v53 }
 0x764   :  { %v1249_v54 = vpop.eup %1248 }
 0x765   :  { %v1251_v55 = vpop.eup %1250  ;;  %v852_v56 = vsel %vm851_vm10, %v849_v38, %v1249_v54 }
 0x766   :  { %1149 = vmatprep.mubr.msk.f32.mxu1 %vm151_vm2, %v852_v56  ;;  %v853_v57 = vsel %vm851_vm10, %v850_v40, %v1251_v55 }
 0x767   :  { %1150 = vmatmul.mubr.msk.f32.vlgmr.msra.gmra.mrb[8].mxu1 %vm151_vm2, %v853_v57 }
 0x83a   :  { %v1151_v59 = vpop.f32.mrb[8].mxu1 }
 0x83b   :  { %v943_v18 = vadd.f32 %v1151_v59, %v993_v58  ;;  %v937_v60 = vpop.f32.mrb[9].mxu1 }
 0x83c   :  { %v938_v17 = vadd.f32 %v993_v58, %v937_v60 }
 0x83d   :  { %v948_v61 = vsel %vm946_vm11, %v943_v18, -inf }
 0x83e   :  { %v947_v62 = vsel %vm946_vm11, %v938_v17, -inf }
 0x83f   :  { %v949_v63 = vmax.f32 %v947_v62, %v948_v61 }
 0x841   :  { %v950_v2 = vsub.f32 %v938_v17, %v949_v63  ;;  %v951_v3 = vsub.f32 %v943_v18, %v949_v63 }
 0x843   :  { %v952_v4 = vmul.f32 1.442695, %v950_v2  ;;  %v954_v5 = vmul.f32 1.442695, %v951_v3 }
 0x845   :  { %1252 = vpow2.f32 %v952_v4 }
 0x846   :  { %1254 = vpow2.f32 %v954_v5 }
 0x84f   :  { %v1253_v6 = vpop.eup %1252 }
 0x850   :  { %v1255_v7 = vpop.eup %1254  ;;  %v956_v9 = vsel %vm946_vm11, %v1253_v6, 0.0 }
 0x851   :  { %v957_v10 = vsel %vm946_vm11, %v1255_v7, 0.0 }
 0x852   :  { %v958_v11 = vadd.f32 %v957_v10, %v956_v9 }
 0x854   :  { %1256 = vrcp.f32 %v958_v11 }
 0x85e   :  { %v1257_v13 = vpop.eup %1256 }
 0x85f   :  { %v960_v14 = vmul.f32 %v1257_v13, %v1253_v6  ;;  %v961_v15 = vmul.f32 %v1257_v13, %v1255_v7 }
 0x861   :  { %962 = vst.msk [vmem:[#allocation7] sm:$0xff] %vm946_vm11, %v960_v14  ;;  %963 = vst.msk [vmem:[#allocation7 + $0x8] sm:$0xff] %vm946_vm11, %v961_v15 }
 0x862   :  { %1313 = shalt.err (!%p1310_p6)
}
 0x863   :  { %s1314_s28 = scalar_lea.hbm %s1560_s7, 256 }
 0x864   :  { %p1315_p7 = scmp.ne.s32.totalorder %s1560_s7, %s1314_s28  ;;  %p1318_p8 = scmp.lt.u32.totalorder %s1314_s28, %s1560_s7 }
 0x866   :  { %p1320_p9 = pnand %p1318_p8, %p1315_p7 }
 0x868   :  { %1323 = shalt.err (!%p1320_p9)
}
 0x869   :  { %975 = dma.vmem_to_hbm [thread:$0]  %s970_s2, 256, %s1560_s7, [#allocation4], %s1331_s11, %s1331_s11, %s1332_s12  }
 0x86a   :  { %1328 = dma.done.wait [#allocation4], 256  }
 0x86b   :  { %1329 = vsyncadd [#allocation4], 4294967040 }
 0x86c   :  { %979 = vsyncpa [#allocation3], 1 }
 0x86d   :  { %980 = vsyncpa [#allocation6], 1 }
 0x86e   :  { %981 = vsyncpa [#allocation4], 1 }

</bundles_post_ra>
